<compile_context>
chip_gen: v6e
topology: v6e:2x2x1
jax: 0.10.0
libtpu: 0.0.40
codegen_flags: <defaults>
</compile_context>

<pallas_src>
import jax
import jax.numpy as jnp
from jax.experimental import pallas as pl
from jax.experimental.pallas import tpu as pltpu

OUT_PAD = 128  # pad 10-wide logits to one full lane width (unmasked vst)


def _round_up(x, m):
    return (x + m - 1) // m * m


def _pick_tile_b(B):
    """Batch tile: <= 1024 rows, 16-aligned, dividing B when possible (no pad copy),
    and giving >= 2 grid steps when B allows it (v7x: 2 TCs share the 'parallel' axis)."""
    cap = 1024
    if B <= cap:
        half = B // 2
        if half >= 16 and half % 16 == 0:
            return half          # two equal tiles -> both v7x TensorCores busy
        return B                 # single full-extent block (any B is legal as a full block)
    for t in range(cap, 0, -16):  # largest 16-aligned tile that divides B exactly
        if B % t == 0:
            return t
    return cap                   # rare: no clean divisor, tail rows get zero-padded


def mlp_kernel(x_ref, w1_ref, b1_ref, w2_ref, b2_ref, w3_ref, b3_ref, o_ref):
    # f32 x tile -> bf16 in-kernel (cheap VPU pack, hidden under the DMA/MXU work).
    x = x_ref[...].astype(jnp.bfloat16)
    # Layer 1: Linear(784 -> 128) + ReLU; bf16 operands, f32 MXU accumulation.
    h1 = jnp.dot(x, w1_ref[...], preferred_element_type=jnp.float32)
    h1 = jnp.maximum(h1 + b1_ref[...], 0.0)            # bias + ReLU in f32
    # Layer 2: Linear(128 -> 64) + ReLU.
    h2 = jnp.dot(h1.astype(jnp.bfloat16), w2_ref[...], preferred_element_type=jnp.float32)
    h2 = jnp.maximum(h2 + b2_ref[...], 0.0)
    # Layer 3: Linear(64 -> 128-padded); lane-dense (tile_b, 128) f32 store.
    out = jnp.dot(h2.astype(jnp.bfloat16), w3_ref[...], preferred_element_type=jnp.float32)
    o_ref[...] = out + b3_ref[...]


def mnist_model_forward(x, params, tile_b=None):
    """x: (B, 1, 28, 28) float32 NCHW. Returns (B, 10) f32 logits."""
    w1, b1, w2, b2, w3, b3 = params
    B = x.shape[0]
    out_dim = w3.shape[1]                      # 10
    x_flat = x.reshape(B, -1)                  # (B, 784), torch .view ordering; stays f32
    d_in = x_flat.shape[1]

    # Zero-pad the last layer to a full 128-lane output (unmasked stores).
    w3p = jnp.zeros((w3.shape[0], OUT_PAD), w3.dtype).at[:, :out_dim].set(w3)
    b3p = jnp.zeros((1, OUT_PAD), b3.dtype).at[:, :out_dim].set(b3)

    # bf16 weights for the MXU; biases stay f32 (added to f32 accumulators).
    w1b = w1.astype(jnp.bfloat16)
    w2b = w2.astype(jnp.bfloat16)
    w3b = w3p.astype(jnp.bfloat16)

    if tile_b is None:
        tile_b = _pick_tile_b(B)
    b_pad = _round_up(B, tile_b)
    if b_pad != B:  # only hit for large batches with no 16-aligned divisor
        x_flat = jnp.pad(x_flat, ((0, b_pad - B), (0, 0)))
    grid = (b_pad // tile_b,)

    resident = lambda shape: pl.BlockSpec(shape, lambda i: (0, 0))  # stays in VMEM

    out_padded = pl.pallas_call(
        mlp_kernel,
        out_shape=jax.ShapeDtypeStruct((b_pad, OUT_PAD), jnp.float32),
        grid=grid,
        in_specs=[
            pl.BlockSpec((tile_b, d_in), lambda i: (i, 0)),  # f32 x tile streams per step
            resident(w1b.shape), resident(b1.shape),
            resident(w2b.shape), resident(b2.shape),
            resident(w3b.shape), resident(b3p.shape),
        ],
        out_specs=pl.BlockSpec((tile_b, OUT_PAD), lambda i: (i, 0)),
        compiler_params=pltpu.CompilerParams(
            dimension_semantics=("parallel",),   # batch axis shards across TCs (v7x)
            vmem_limit_bytes=32 << 20,
        ),
    )(x_flat, w1b, b1, w2b, b2, w3b, b3p)

    return out_padded[:B, :out_dim]


def init_params(key):
    """Deterministic init matching nn.Linear default (uniform +/- 1/sqrt(fan_in)).
    Weights stored as (in_features, out_features) so the kernel does x @ W + b."""
    dims = [(784, 128), (128, 64), (64, 10)]
    params = []
    keys = jax.random.split(key, 2 * len(dims))
    for i, (fin, fout) in enumerate(dims):
        bound = 1.0 / (fin ** 0.5)
        w = jax.random.uniform(keys[2 * i], (fin, fout), jnp.float32, -bound, bound)
        b = jax.random.uniform(keys[2 * i + 1], (1, fout), jnp.float32, -bound, bound)
        params.extend([w, b])
    return tuple(params)


if __name__ == "__main__":
    key = jax.random.PRNGKey(0)
    k_x, k_p = jax.random.split(key)

    # Small batch of MNIST-shaped inputs (B, 1, 28, 28).
    x = jax.random.normal(k_x, (2, 1, 28, 28), dtype=jnp.float32)
    params = init_params(k_p)

    logits = mnist_model_forward(x, params)
    jax.block_until_ready(logits)
    assert logits.shape == (2, 10)

    w1, b1, w2, b2, w3, b3 = params
    xf = x.reshape(x.shape[0], -1)

    # Reference mirroring the kernel's bf16 quantization (f32 accumulation).
    bf = lambda a: a.astype(jnp.bfloat16).astype(jnp.float32)
    ref_q = jnp.maximum(bf(xf) @ bf(w1) + b1, 0.0)
    ref_q = jnp.maximum(bf(ref_q) @ bf(w2) + b2, 0.0)
    ref_q = bf(ref_q) @ bf(w3) + b3
    assert jnp.allclose(logits, ref_q, atol=2e-3, rtol=2e-3)

    # Pure f32 reference (module semantics) — looser tolerance due to bf16 compute.
    ref = jnp.maximum(xf @ w1 + b1, 0.0)
    ref = jnp.maximum(ref @ w2 + b2, 0.0)
    ref = ref @ w3 + b3
    assert jnp.allclose(logits, ref, atol=5e-2, rtol=5e-2)

    print("KERNEL_OK")
</pallas_src>

<mosaic_0001>
module attributes {stable_mosaic.version = 11 : i64} {
  func.func @mlp_kernel(%arg0: i32, %arg1: memref<2x784xf32, #tpu.memory_space<vmem>>, %arg2: memref<784x128xbf16, #tpu.memory_space<vmem>>, %arg3: memref<1x128xf32, #tpu.memory_space<vmem>>, %arg4: memref<128x64xbf16, #tpu.memory_space<vmem>>, %arg5: memref<1x64xf32, #tpu.memory_space<vmem>>, %arg6: memref<64x128xbf16, #tpu.memory_space<vmem>>, %arg7: memref<1x128xf32, #tpu.memory_space<vmem>>, %arg8: memref<2x128xf32, #tpu.memory_space<vmem>>) attributes {dimension_semantics = [#tpu.dimension_semantics<parallel>], iteration_bounds = array<i64: 1>, scalar_prefetch = 0 : i64, scratch_operands = 0 : i64, tpu.core_type = #tpu.core_type<tc>, window_params = [{transform_indices = @transform_0, window_bounds = array<i64: 2, 784>}, {pipeline_mode = #tpu.pipeline_mode<synchronous>, transform_indices = @transform_1, window_bounds = array<i64: 784, 128>}, {pipeline_mode = #tpu.pipeline_mode<synchronous>, transform_indices = @transform_2, window_bounds = array<i64: 1, 128>}, {pipeline_mode = #tpu.pipeline_mode<synchronous>, transform_indices = @transform_3, window_bounds = array<i64: 128, 64>}, {pipeline_mode = #tpu.pipeline_mode<synchronous>, transform_indices = @transform_4, window_bounds = array<i64: 1, 64>}, {pipeline_mode = #tpu.pipeline_mode<synchronous>, transform_indices = @transform_5, window_bounds = array<i64: 64, 128>}, {pipeline_mode = #tpu.pipeline_mode<synchronous>, transform_indices = @transform_6, window_bounds = array<i64: 1, 128>}, {transform_indices = @transform_7, window_bounds = array<i64: 2, 128>}]} {
    %c0 = arith.constant 0 : index
    %c0_0 = arith.constant 0 : index
    %0 = vector.load %arg1[%c0, %c0_0] : memref<2x784xf32, #tpu.memory_space<vmem>>, vector<2x784xf32>
    %1 = arith.truncf %0 : vector<2x784xf32> to vector<2x784xbf16>
    %c0_1 = arith.constant 0 : index
    %c0_2 = arith.constant 0 : index
    %2 = vector.load %arg2[%c0_1, %c0_2] : memref<784x128xbf16, #tpu.memory_space<vmem>>, vector<784x128xbf16>
    %cst = arith.constant dense<0.000000e+00> : vector<2x128xf32>
    %3 = tpu.matmul %1, %2, %cst {dimension_numbers = #tpu.dot_dimension_numbers<[1], [0], [0], [1], [0, 0, 1, 1], [], []>} : vector<2x784xbf16>, vector<784x128xbf16>, vector<2x128xf32> -> vector<2x128xf32>
    %c0_3 = arith.constant 0 : index
    %c0_4 = arith.constant 0 : index
    %4 = vector.load %arg3[%c0_3, %c0_4] : memref<1x128xf32, #tpu.memory_space<vmem>>, vector<1x128xf32>
    %5 = vector.broadcast %4 : vector<1x128xf32> to vector<2x128xf32>
    %6 = arith.addf %3, %5 : vector<2x128xf32>
    %cst_5 = arith.constant 0.000000e+00 : f32
    %7 = vector.broadcast %cst_5 : f32 to vector<2x128xf32>
    %8 = arith.maximumf %6, %7 : vector<2x128xf32>
    %9 = arith.truncf %8 : vector<2x128xf32> to vector<2x128xbf16>
    %c0_6 = arith.constant 0 : index
    %c0_7 = arith.constant 0 : index
    %10 = vector.load %arg4[%c0_6, %c0_7] : memref<128x64xbf16, #tpu.memory_space<vmem>>, vector<128x64xbf16>
    %cst_8 = arith.constant dense<0.000000e+00> : vector<2x64xf32>
    %11 = tpu.matmul %9, %10, %cst_8 {dimension_numbers = #tpu.dot_dimension_numbers<[1], [0], [0], [1], [0, 0, 1, 1], [], []>} : vector<2x128xbf16>, vector<128x64xbf16>, vector<2x64xf32> -> vector<2x64xf32>
    %c0_9 = arith.constant 0 : index
    %c0_10 = arith.constant 0 : index
    %12 = vector.load %arg5[%c0_9, %c0_10] : memref<1x64xf32, #tpu.memory_space<vmem>>, vector<1x64xf32>
    %13 = vector.broadcast %12 : vector<1x64xf32> to vector<2x64xf32>
    %14 = arith.addf %11, %13 : vector<2x64xf32>
    %cst_11 = arith.constant 0.000000e+00 : f32
    %15 = vector.broadcast %cst_11 : f32 to vector<2x64xf32>
    %16 = arith.maximumf %14, %15 : vector<2x64xf32>
    %17 = arith.truncf %16 : vector<2x64xf32> to vector<2x64xbf16>
    %c0_12 = arith.constant 0 : index
    %c0_13 = arith.constant 0 : index
    %18 = vector.load %arg6[%c0_12, %c0_13] : memref<64x128xbf16, #tpu.memory_space<vmem>>, vector<64x128xbf16>
    %cst_14 = arith.constant dense<0.000000e+00> : vector<2x128xf32>
    %19 = tpu.matmul %17, %18, %cst_14 {dimension_numbers = #tpu.dot_dimension_numbers<[1], [0], [0], [1], [0, 0, 1, 1], [], []>} : vector<2x64xbf16>, vector<64x128xbf16>, vector<2x128xf32> -> vector<2x128xf32>
    %c0_15 = arith.constant 0 : index
    %c0_16 = arith.constant 0 : index
    %20 = vector.load %arg7[%c0_15, %c0_16] : memref<1x128xf32, #tpu.memory_space<vmem>>, vector<1x128xf32>
    %21 = vector.broadcast %20 : vector<1x128xf32> to vector<2x128xf32>
    %22 = arith.addf %19, %21 : vector<2x128xf32>
    %c0_17 = arith.constant 0 : index
    %c0_18 = arith.constant 0 : index
    %23 = vector.load %arg8[%c0_17, %c0_18] : memref<2x128xf32, #tpu.memory_space<vmem>>, vector<2x128xf32>
    tpu.vector_store %arg8[%c0_17, %c0_18], %22 {strides = array<i32>} : memref<2x128xf32, #tpu.memory_space<vmem>>, vector<2x128xf32>,
    return
  }
  func.func @transform_0(%arg0: i32) -> (i32, i32) {
    %c0_i32 = arith.constant 0 : i32
    %c0_i32_0 = arith.constant 0 : i32
    return %arg0, %c0_i32 : i32, i32
  }
  func.func @transform_1(%arg0: i32) -> (i32, i32) {
    %c0_i32 = arith.constant 0 : i32
    %c0_i32_0 = arith.constant 0 : i32
    %c0_i32_1 = arith.constant 0 : i32
    return %c0_i32, %c0_i32_0 : i32, i32
  }
  func.func @transform_2(%arg0: i32) -> (i32, i32) {
    %c0_i32 = arith.constant 0 : i32
    %c0_i32_0 = arith.constant 0 : i32
    %c0_i32_1 = arith.constant 0 : i32
    return %c0_i32, %c0_i32_0 : i32, i32
  }
  func.func @transform_3(%arg0: i32) -> (i32, i32) {
    %c0_i32 = arith.constant 0 : i32
    %c0_i32_0 = arith.constant 0 : i32
    %c0_i32_1 = arith.constant 0 : i32
    return %c0_i32, %c0_i32_0 : i32, i32
  }
  func.func @transform_4(%arg0: i32) -> (i32, i32) {
    %c0_i32 = arith.constant 0 : i32
    %c0_i32_0 = arith.constant 0 : i32
    %c0_i32_1 = arith.constant 0 : i32
    return %c0_i32, %c0_i32_0 : i32, i32
  }
  func.func @transform_5(%arg0: i32) -> (i32, i32) {
    %c0_i32 = arith.constant 0 : i32
    %c0_i32_0 = arith.constant 0 : i32
    %c0_i32_1 = arith.constant 0 : i32
    return %c0_i32, %c0_i32_0 : i32, i32
  }
  func.func @transform_6(%arg0: i32) -> (i32, i32) {
    %c0_i32 = arith.constant 0 : i32
    %c0_i32_0 = arith.constant 0 : i32
    %c0_i32_1 = arith.constant 0 : i32
    return %c0_i32, %c0_i32_0 : i32, i32
  }
  func.func @transform_7(%arg0: i32) -> (i32, i32) {
    %c0_i32 = arith.constant 0 : i32
    %c0_i32_0 = arith.constant 0 : i32
    return %arg0, %c0_i32 : i32, i32
  }
}

</mosaic_0001>

<bundles_post_ra>
// kernel: tpu_custom_call.1
= control target key start
LH: loop header
LB: loop body
LE: loop exit
PB: predicated region body
PF: predicated region fallthrough
CT: control target
= control target key end

     0   :  { %12 = vsyncpa [#allocation3], 0  ;;  %s1294_s0 = inlined_call_operand.vmem [shape: f32[2,784], index: 0, kind: input, shape index: {}]   ;;  %s1295_s1 = inlined_call_operand.hbm [shape: bf16[784,128], index: 1, kind: input, shape index: {}]   ;;  %s1296_s2 = inlined_call_operand.vmem [shape: f32[1,128], index: 2, kind: input, shape index: {}]   ;;  %s1297_s3 = inlined_call_operand.vmem [shape: bf16[128,64], index: 3, kind: input, shape index: {}]   ;;  %s1298_s4 = inlined_call_operand.vmem [shape: f32[1,64], index: 4, kind: input, shape index: {}]   ;;  %s1299_s5 = inlined_call_operand.vmem [shape: bf16[64,128], index: 5, kind: input, shape index: {}]   ;;  %s1300_s6 = inlined_call_operand.vmem [shape: f32[1,128], index: 6, kind: input, shape index: {}]   ;;  %s1301_s7 = inlined_call_operand.hbm [shape: f32[2,128], index: 7, kind: output, shape index: {}]  }
   0x1   :  { %13 = vsyncpa [#allocation4], 0  ;;  %s1170_s24 = smov [#allocation2]  }
   0x2   :  { %s21_s25 = sshll.u32 %s1170_s24, 4  ;;  %s22_s25 = int_to_ptr.vmem [resolvable:$true] %s21_s25 }
   0x3   :  { %s1134_s26 = scalar_lea.vmem %s22_s25, 6272  ;;  %p1139_p1 = scmp.lt.s32.totalorder %s22_s25, %s22_s25 }
   0x4   :  { %p1135_p0 = scmp.ne.s32.totalorder %s22_s25, %s1134_s26  ;;  %p1140_p2 = scmp.lt.s32.totalorder %s1134_s26, %s1134_s26 }
   0x6   :  { %p1141_p3 = por %p1140_p2, %p1139_p1 }
   0x8   :  { %p1142_p4 = pnand %p1141_p3, %p1135_p0 }
   0xa   :  { %1145 = shalt.err (!%p1142_p4)
}
   0xb   :  { %s1171_s27 = smov 64   ;;  %s1172_s28 = smov 4  }
   0xc   :  { %27 = dma.hbm_to_vmem [thread:$0]  %s1295_s1, 6272, %s22_s25, [#allocation3], %s1171_s27, %s1171_s27, %s1172_s28  }
   0xd   :  { %1166 = dma.done.wait [#allocation3], 6272  }
   0xe   :  { %1167 = vsyncadd [#allocation3], 4294961024  ;;  %v1063_v0 = vld [vmem:[#allocation2 + $0x78] sm:$0xff]   ;;  %v1067_v4 = vld [vmem:[#allocation2 + $0x70] sm:$0xff]   ;;  %v1173_v21 = vmov 1983009808   ;;  %v50_v23 = vlaneseq }
   0xf   :  { %v1064_v1 = vld [vmem:[#allocation2 + $0x38] sm:$0xff]   ;;  %936 = vmatprep.subr.bf16.mxu0 %v1063_v0  ;;  %v1068_v5 = vld [vmem:[#allocation2 + $0x30] sm:$0xff]   ;;  %v1071_v8 = vld [vmem:[#allocation2 + $0x68] sm:$0xff]   ;;  %v48_v22 = vunpack.c.l.s4 %v1173_v21  ;;  %v1174_v45 = vmov 0.0   ;;  %vm1175_vm0 = vmmov 0   ;;  %vm492_vm1 = vcmask 130048  }
  0x10   :  { %v1065_v2 = vld [vmem:[#allocation2 + $0xf8] sm:$0xff]   ;;  %937 = vmatpush3.bf16.msra.mxu0 %v1064_v1  ;;  %v1069_v6 = vld [vmem:[#allocation2 + $0xf0] sm:$0xff]   ;;  %v1072_v9 = vld [vmem:[#allocation2 + $0x28] sm:$0xff]   ;;  %v51_v29 = vshrl.u32 %v50_v23, 7  ;;  %vm810_vm2 = vcmask 523264   ;;  %s1176_s13 = smov [#allocation5]  }
  0x11   :  { %v1066_v3 = vld [vmem:[#allocation2 + $0xb8] sm:$0xff]   ;;  %958 = vmatprep.subr.bf16.mxu1 %v1065_v2  ;;  %938 = vmatprep.subr.bf16.mxu0 %v1067_v4  ;;  %v1070_v7 = vld [vmem:[#allocation2 + $0xb0] sm:$0xff]   ;;  %v1073_v10 = vld [vmem:[#allocation2 + $0xe8] sm:$0xff]   ;;  %v49_v28 = vunpack.c.0.s8 %v48_v22 }
  0x12   :  { %959 = vmatpush3.bf16.msra.mxu1 %v1066_v3  ;;  %v1074_v11 = vld [vmem:[#allocation2 + $0xa8] sm:$0xff]   ;;  %v1075_v12 = vld [vmem:[#allocation2 + $0x60] sm:$0xff]   ;;  %v1079_v16 = vld [vmem:[#allocation2 + $0x58] sm:$0xff]  }
  0x13   :  { %960 = vmatprep.subr.bf16.mxu1 %v1069_v6  ;;  %v1076_v13 = vld [vmem:[#allocation2 + $0x20] sm:$0xff]   ;;  %v1080_v17 = vld [vmem:[#allocation2 + $0x18] sm:$0xff]   ;;  %v1083_v20 = vld [vmem:[#allocation2 + $0x50] sm:$0xff]   ;;  %v52_v34 = vsub.s32 %v49_v28, %v51_v29 }
  0x14   :  { %939 = vmatpush3.bf16.msra.mxu0 %v1068_v5  ;;  %v1077_v14 = vld [vmem:[#allocation2 + $0xe0] sm:$0xff]   ;;  %v1081_v18 = vld [vmem:[#allocation2 + $0xd8] sm:$0xff]   ;;  %v1084_v24 = vld [vmem:[#allocation2 + $0x10] sm:$0xff]  }
  0x15   :  { %940 = vmatprep.subr.bf16.mxu0 %v1071_v8  ;;  %v1078_v15 = vld [vmem:[#allocation2 + $0xa0] sm:$0xff]   ;;  %v1082_v19 = vld [vmem:[#allocation2 + $0x98] sm:$0xff]   ;;  %v1085_v25 = vld [vmem:[#allocation2 + $0xd0] sm:$0xff]  }
  0x16   :  { %961 = vmatpush3.bf16.msra.mxu1 %v1070_v7  ;;  %v1086_v26 = vld [vmem:[#allocation2 + $0x90] sm:$0xff]   ;;  %v1087_v27 = vld [vmem:[#allocation2 + $0x48] sm:$0xff]   ;;  %v1091_v33 = vld [vmem:[#allocation2 + $0x40] sm:$0xff]  }
  0x17   :  { %962 = vmatprep.subr.bf16.mxu1 %v1073_v10  ;;  %v1088_v30 = vld [vmem:[#allocation2 + $0x8] sm:$0xff]   ;;  %v1092_v35 = vld [vmem:[#allocation2] sm:$0xff]   ;;  %v1095_v41 = vld [vmem:[#allocation2 + $0x178] sm:$0xff]  }
  0x18   :  { %941 = vmatpush3.bf16.msra.mxu0 %v1072_v9  ;;  %v1089_v31 = vld [vmem:[#allocation2 + $0xc8] sm:$0xff]   ;;  %v1093_v36 = vld [vmem:[#allocation2 + $0xc0] sm:$0xff]   ;;  %v1097_v48 = vld [vmem:[#allocation2 + $0x138] sm:$0xff]  }
  0x19   :  { %942 = vmatprep.subr.bf16.mxu0 %v1075_v12  ;;  %v1090_v32 = vld [vmem:[#allocation2 + $0x88] sm:$0xff]   ;;  %v42_v37 = vld [vmem:[%s1294_s0] sm:$0xff]  ;;  %v1098_v50 = vld [vmem:[#allocation2 + $0x170] sm:$0xff]  }
  0x1a   :  { %963 = vmatpush3.bf16.msra.mxu1 %v1074_v11  ;;  %v53_v38 = vrot.slane %v42_v37, %v52_v34  ;;  %v1094_v39 = vld [vmem:[#allocation2 + $0x80] sm:$0xff]   ;;  %v46_v40 = vcombine.high %v42_v37, %v42_v37  ;;  %v1099_v52 = vld [vmem:[#allocation2 + $0x130] sm:$0xff]   ;;  %v1100_v53 = vld [vmem:[#allocation2 + $0x168] sm:$0xff]  }
  0x1b   :  { %964 = vmatprep.subr.bf16.mxu1 %v1077_v14  ;;  %v1101_v54 = vld [vmem:[#allocation2 + $0x128] sm:$0xff]   ;;  %v1102_v55 = vld [vmem:[#allocation2 + $0x160] sm:$0xff]   ;;  %v1104_v57 = vld [vmem:[#allocation2 + $0x158] sm:$0xff]  }
  0x1c   :  { %943 = vmatpush3.bf16.msra.mxu0 %v1076_v13  ;;  %v61_v42 = vcombine.high %v53_v38, %v53_v38  ;;  %v60_v43 = vrot.slane %v46_v40, %v52_v34  ;;  %v86_v44 = vpack.c.bf16 %v53_v38, %v53_v38  ;;  %v1103_v56 = vld [vmem:[#allocation2 + $0x120] sm:$0xff]   ;;  %v43_v59 = vld [vmem:[%s1294_s0 + $0x8] sm:$0x3f]  ;;  %v1105_v60 = vld [vmem:[#allocation2 + $0x118] sm:$0xff]  }
  0x1d   :  { %944 = vmatprep.subr.bf16.mxu0 %v1079_v16  ;;  %v1112_v58 = vld [vmem:[#allocation2 + $0x180] sm:$0xff]   ;;  %v63_v61 = vcombine.high %v43_v59, %v43_v59  ;;  %v70_v62 = vrot.slane %v43_v59, %v52_v34  ;;  %v1106_v63 = vld [vmem:[#allocation2 + $0x150] sm:$0xff]   ;;  %v1108_v5 = vld [vmem:[#allocation2 + $0x148] sm:$0xff]  }
  0x1e   :  { %965 = vmatpush3.bf16.msra.mxu1 %v1078_v15  ;;  %v87_v46 = vpack.c.bf16 %v61_v42, %v61_v42  ;;  %v62_v47 = vcombine.high %v60_v43, %v60_v43  ;;  %v88_v49 = vpack.c.bf16 %v60_v43, %v60_v43  ;;  %v1107_v2 = vld [vmem:[#allocation2 + $0x110] sm:$0xff]   ;;  %v1109_v6 = vld [vmem:[#allocation2 + $0x108] sm:$0xff]   ;;  %v1110_v7 = vld [vmem:[#allocation2 + $0x140] sm:$0xff]  }
  0x1f   :  { %966 = vmatprep.subr.bf16.mxu1 %v1081_v18  ;;  %v77_v0 = vrot.slane %v63_v61, %v52_v34  ;;  %v78_v1 = vcombine.high %v70_v62, %v70_v62  ;;  %v1111_v8 = vld [vmem:[#allocation2 + $0x100] sm:$0xff]   ;;  %v90_v9 = vpack.c.bf16 %v70_v62, %v70_v62  ;;  %v1114_v10 = vld [vmem:[%s1297_s3 + $0x38] sm:$0xff]   ;;  %v1115_v11 = vld [vmem:[%s1297_s3 + $0x30] sm:$0xff]  }
  0x20   :  { %945 = vmatpush3.bf16.msra.mxu0 %v1080_v17  ;;  %528 = vmatprep.mubr.bf16.mxu0 %v87_v46  ;;  %v89_v51 = vpack.c.bf16 %v62_v47, %v62_v47  ;;  %v1116_v12 = vld [vmem:[%s1297_s3 + $0x28] sm:$0xff]   ;;  %v1117_v13 = vld [vmem:[%s1297_s3 + $0x20] sm:$0xff]   ;;  %v1118_v14 = vld [vmem:[%s1297_s3 + $0x18] sm:$0xff]  }
  0x21   :  { %946 = vmatprep.subr.bf16.mxu0 %v1083_v20  ;;  %v91_v3 = vpack.c.bf16 %v78_v1, %v78_v1  ;;  %v92_v4 = vpack.c.bf16 %v77_v0, %v77_v0  ;;  %v1119_v15 = vld [vmem:[%s1297_s3 + $0x10] sm:$0xff]   ;;  %v1120_v16 = vld [vmem:[%s1297_s3 + $0x8] sm:$0xff]   ;;  %v1121_v17 = vld [vmem:[%s1297_s3] sm:$0xff]  }
  0x22   :  { %967 = vmatpush3.bf16.msra.mxu1 %v1082_v19  ;;  %568 = vmatprep.mubr.bf16.mxu1 %v89_v51  ;;  %v1122_v18 = vld [vmem:[%s1299_s5 + $0x18] sm:$0xff]   ;;  %v1123_v19 = vld [vmem:[%s1299_s5 + $0x10] sm:$0xff]   ;;  %v1124_v47 = vld [vmem:[%s1299_s5 + $0x8] sm:$0xff]  }
  0x23   :  { %968 = vmatprep.subr.bf16.mxu1 %v1085_v25 }
  0x24   :  { %947 = vmatpush3.bf16.msra.mxu0 %v1084_v24 }
  0x25   :  { %948 = vmatprep.subr.bf16.mxu0 %v1087_v27 }
  0x26   :  { %969 = vmatpush3.bf16.msra.mxu1 %v1086_v26 }
  0x27   :  { %970 = vmatprep.subr.bf16.mxu1 %v1089_v31 }
  0x28   :  { %949 = vmatpush3.bf16.msra.mxu0 %v1088_v30 }
  0x29   :  { %950 = vmatprep.subr.bf16.mxu0 %v1091_v33  ;;  %v870_v33 = vld [vmem:[%s1296_s2] ss:$0 sm:$0xff] }
  0x2a   :  { %971 = vmatpush3.bf16.msra.mxu1 %v1090_v32 }
  0x2b   :  { %972 = vmatprep.subr.bf16.mxu1 %v1093_v36 }
  0x2c   :  { %951 = vmatpush3.bf16.msra.mxu0 %v1092_v35 }
  0x2d   :  { %980 = vmatprep.subr.bf16.mxu0 %v1095_v41 }
  0x2e   :  { %973 = vmatpush3.bf16.msra.mxu1 %v1094_v39 }
  0x2f   :  { %1018 = vmatprep.subr.bf16.mxu1 %v1174_v45  ;;  %529 = vmatmul.mubr.bf16.vlgmr.msra.gmra.mxu0 %v86_v44 }
  0x30   :  { %981 = vmatpush3.bf16.msra.mxu0 %v1097_v48  ;;  %608 = vmatprep.mubr.bf16.mxu0 %v91_v3  ;;  %v1125_v48 = vld [vmem:[%s1299_s5] sm:$0xff]   ;;  %s861_s5 = sshll.u32 %s1176_s13, 4  ;;  %s862_s5 = int_to_ptr.vmem [resolvable:$true] %s861_s5 }
  0x31   :  { %569 = vmatmul.mubr.bf16.vlgmr.msra.gmra.mxu1 %v88_v49  ;;  %982 = vmatprep.subr.bf16.mxu0 %v1098_v50  ;;  %v921_v49 = vld [vmem:[%s1298_s4] ss:$0 sm:$0xff]  ;;  %s1146_s4 = scalar_lea.vmem %s862_s5, 32  ;;  %p1151_p6 = scmp.lt.s32.totalorder %s862_s5, %s862_s5 }
  0x32   :  { %1020 = vmatprep.mubr.msk.bf16.mxu1 %vm1175_vm0, %v1174_v45  ;;  %1019 = vmatpush3.bf16.msra.mxu1 %v1112_v58  ;;  %p1147_p5 = scmp.ne.s32.totalorder %s862_s5, %s1146_s4  ;;  %p1152_p7 = scmp.lt.s32.totalorder %s1146_s4, %s1146_s4 }
  0x33   :  { %1024 = vmatprep.subr.bf16.mxu1 %v1174_v45 }
  0x34   :  { %983 = vmatpush3.bf16.msra.mxu0 %v1099_v52  ;;  %p1153_p8 = por %p1152_p7, %p1151_p6 }
  0x35   :  { %984 = vmatprep.subr.bf16.mxu0 %v1100_v53 }
  0x36   :  { %p1154_p9 = pnand %p1153_p8, %p1147_p5 }
  0x38   :  { %985 = vmatpush3.bf16.msra.mxu0 %v1101_v54 }
  0x39   :  { %986 = vmatprep.subr.bf16.mxu0 %v1102_v55  ;;  %1021 = vmatmul.mubr.msk.bf16.vlgmr.msra.gmra.mxu1 %vm492_vm1, %v92_v4 }
  0x3a   :  { %1040 = vmatprep.mubr.msk.bf16.mxu1 %vm1175_vm0, %v1174_v45  ;;  %1025 = vmatpush3.bf16.msra.mxu1 %v1114_v10 }
  0x3b   :  { %1026 = vmatprep.subr.bf16.mxu1 %v1174_v45 }
  0x3c   :  { %987 = vmatpush3.bf16.msra.mxu0 %v1103_v56 }
  0x3d   :  { %988 = vmatprep.subr.bf16.mxu0 %v1104_v57 }
  0x3e   :  { %1027 = vmatpush3.bf16.msra.mxu1 %v1115_v11 }
  0x3f   :  { %1028 = vmatprep.subr.bf16.mxu1 %v1174_v45 }
  0x40   :  { %989 = vmatpush3.bf16.msra.mxu0 %v1105_v60 }
  0x41   :  { %990 = vmatprep.subr.bf16.mxu0 %v1106_v63 }
  0x42   :  { %1029 = vmatpush3.bf16.msra.mxu1 %v1116_v12 }
  0x43   :  { %1030 = vmatprep.subr.bf16.mxu1 %v1174_v45 }
  0x44   :  { %991 = vmatpush3.bf16.msra.mxu0 %v1107_v2 }
  0x45   :  { %992 = vmatprep.subr.bf16.mxu0 %v1108_v5 }
  0x46   :  { %1031 = vmatpush3.bf16.msra.mxu1 %v1117_v13 }
  0x47   :  { %1032 = vmatprep.subr.bf16.mxu1 %v1174_v45 }
  0x48   :  { %993 = vmatpush3.bf16.msra.mxu0 %v1109_v6 }
  0x49   :  { %994 = vmatprep.subr.bf16.mxu0 %v1110_v7 }
  0x4a   :  { %1033 = vmatpush3.bf16.msra.mxu1 %v1118_v14 }
  0x4b   :  { %1034 = vmatprep.subr.bf16.mxu1 %v1174_v45 }
  0x4c   :  { %995 = vmatpush3.bf16.msra.mxu0 %v1111_v8 }
  0x4d   :  { %1044 = vmatprep.subr.bf16.mxu0 %v1174_v45 }
  0x4e   :  { %1035 = vmatpush3.bf16.msra.mxu1 %v1119_v15 }
  0x4f   :  { %609 = vmatmul.mubr.bf16.vlgmr.msra.gmra.mxu0 %v90_v9  ;;  %1036 = vmatprep.subr.bf16.mxu1 %v1174_v45 }
  0x50   :  { %1052 = vmatprep.mubr.msk.bf16.mxu0 %vm1175_vm0, %v1174_v45  ;;  %1045 = vmatpush3.bf16.msra.mxu0 %v1122_v18 }
  0x51   :  { %1046 = vmatprep.subr.bf16.mxu0 %v1174_v45 }
  0x52   :  { %1037 = vmatpush3.bf16.msra.mxu1 %v1120_v16 }
  0x53   :  { %1038 = vmatprep.subr.bf16.mxu1 %v1174_v45 }
  0x54   :  { %1047 = vmatpush3.bf16.msra.mxu0 %v1123_v19 }
  0x55   :  { %1048 = vmatprep.subr.bf16.mxu0 %v1174_v45 }
  0x56   :  { %1039 = vmatpush3.bf16.msra.mxu1 %v1121_v17 }
  0x58   :  { %1049 = vmatpush3.bf16.msra.mxu0 %v1124_v47 }
  0x59   :  { %1050 = vmatprep.subr.bf16.mxu0 %v1174_v45  ;;  %v930_v45 = vld [vmem:[%s1300_s6] ss:$0 sm:$0xff] }
  0x5c   :  { %1051 = vmatpush3.bf16.msra.mxu0 %v1125_v48 }
  0xef   :  { %v952_v20 = vpop.f32.mrf.mxu0 }
  0xf1   :  { %v953_v21 = vpop.f32.mrf.mxu0  ;;  %v974_v22 = vpop.f32.mrf.mxu1 }
  0xf2   :  { %v954_v32 = vadd.f32 %v953_v21, %v952_v20 }
  0xf3   :  { %v955_v23 = vpop.f32.mrf.mxu0  ;;  %v975_v24 = vpop.f32.mrf.mxu1 }
  0xf4   :  { %v531_v34 = vadd.f32 %v954_v32, %v870_v33  ;;  %v976_v35 = vadd.f32 %v975_v24, %v974_v22 }
  0xf5   :  { %v956_v25 = vpop.f32.mrf.mxu0  ;;  %v977_v26 = vpop.f32.mrf.mxu1 }
  0xf6   :  { %v571_v38 = vadd.f32 %v976_v35, %v531_v34 }
  0xf7   :  { %v978_v27 = vpop.f32.mrf.mxu1 }
  0xf9   :  { %v650_v28 = vpop.f32.mrf.mxu1 }
  0xfb   :  { %v1022_v29 = vpop.f32.mrf.mxu1 }
  0xfd   :  { %v653_v30 = vpop.f32.mrf.mxu1 }
  0xff   :  { %v1023_v31 = vpop.f32.mrf.mxu1 }
 0x10f   :  { %v996_v36 = vpop.f32.mrf.mxu0 }
 0x111   :  { %v997_v37 = vpop.f32.mrf.mxu0 }
 0x112   :  { %v998_v39 = vadd.f32 %v997_v37, %v996_v36 }
 0x113   :  { %v999_v40 = vpop.f32.mrf.mxu0 }
 0x114   :  { %v611_v41 = vadd.f32 %v998_v39, %v571_v38 }
 0x115   :  { %v1000_v42 = vpop.f32.mrf.mxu0 }
 0x116   :  { %v651_v43 = vadd.f32 %v650_v28, %v611_v41 }
 0x118   :  { %v656_v44 = vmax.f32 %v651_v43, 0.0 }
 0x11a   :  { %v657_v46 = vpack.c.bf16 %v656_v44, %v656_v44 }
 0x11c   :  { %1041 = vmatmul.mubr.bf16.vlgmr.msra.gmra.mxu1 %v657_v46 }
 0x1dc   :  { %v763_v50 = vpop.f32.mrf.mxu1 }
 0x1dd   :  { %v764_v51 = vadd.f32 %v921_v49, %v763_v50 }
 0x1de   :  { %v1042_v52 = vpop.f32.mrf.mxu1 }
 0x1df   :  { %v769_v53 = vmax.f32 %v764_v51, 0.0 }
 0x1e0   :  { %v766_v54 = vpop.f32.mrf.mxu1 }
 0x1e1   :  { %v770_v55 = vpack.c.bf16 %v769_v53, %v769_v53 }
 0x1e2   :  { %v1043_v56 = vpop.f32.mrf.mxu1 }
 0x1e3   :  { %1053 = vmatmul.mubr.msk.bf16.vlgmr.msra.gmra.mxu0 %vm810_vm2, %v770_v55 }
 0x2a3   :  { %v848_v57 = vpop.f32.mrf.mxu0 }
 0x2a4   :  { %v849_v58 = vadd.f32 %v930_v45, %v848_v57 }
 0x2a5   :  { %v1054_v59 = vpop.f32.mrf.mxu0 }
 0x2a6   :  { %854 = vst [vmem:[#allocation5] sm:$0x3] %v849_v58 }
 0x2a7   :  { %v851_v60 = vpop.f32.mrf.mxu0 }
 0x2a8   :  { %1157 = shalt.err (!%p1154_p9)
}
 0x2a9   :  { %864 = dma.vmem_to_hbm [thread:$0]  %s862_s5, 32, %s1301_s7, [#allocation4]   ;;  %v1055_v61 = vpop.f32.mrf.mxu0 }
 0x2aa   :  { %1168 = dma.done.wait [#allocation4], 32  }
 0x2ab   :  { %1169 = vsyncadd [#allocation4], 4294967264 }
 0x2ac   :  { %868 = vsyncpa [#allocation3], 1 }
 0x2ad   :  { %869 = vsyncpa [#allocation4], 1 }

</bundles_post_ra>
